<compile_context>
chip_gen: v7x
topology: tpu7x:2x2x1
jax: 0.10.0
libtpu: 0.0.40
codegen_flags: <defaults>
</compile_context>

<pallas_src>
import jax
import jax.numpy as jnp
from jax.experimental import pallas as pl
from jax.experimental.pallas import tpu as pltpu

IN_FEATURES = 784
OUT_FEATURES = 10
H_PAD = 128    # padded hidden / output width (lane-dense)


def mnist_mlp_kernel(x_ref, w1_ref, w2_ref, w3_ref, w4_ref, b_ref, o_ref):
    # x: [TB, 784] f32 (cast to bf16 here); weights bf16; b: [4, 128] f32;
    # output: [TB, 128] bf16 (f32 accumulation throughout).
    x = x_ref[...].astype(jnp.bfloat16)

    h = jnp.dot(x, w1_ref[...], preferred_element_type=jnp.float32) + b_ref[0:1, :]
    h = jnp.maximum(h, 0.0)                                   # ReLU (f32)

    h = jnp.dot(h.astype(jnp.bfloat16), w2_ref[...],
                preferred_element_type=jnp.float32) + b_ref[1:2, :]
    h = jnp.maximum(h, 0.0)                                   # ReLU (f32)

    h = jnp.dot(h.astype(jnp.bfloat16), w3_ref[...],
                preferred_element_type=jnp.float32) + b_ref[2:3, :]
    h = jnp.maximum(h, 0.0)                                   # ReLU (f32)

    h = jnp.dot(h.astype(jnp.bfloat16), w4_ref[...],
                preferred_element_type=jnp.float32) + b_ref[3:4, :]

    o_ref[...] = h.astype(o_ref.dtype)                        # lane-dense bf16 store


def _round_up(n, m):
    return ((n + m - 1) // m) * m


def _pad2d(a, rows, cols):
    return jnp.pad(a, ((0, rows - a.shape[0]), (0, cols - a.shape[1])))


def _choose_batch_tiling(B):
    """Pick (TB, Bp, n_steps): TB multiple of 8, <= 1024, minimal batch padding,
    and >= 2 grid steps for mid/large batches (keeps both v7x TensorCores busy)."""
    TB_MAX = 1024                                  # f32 x tile ~3.1 MiB; 2x-buffered fits v5e's 16 MiB default
    n_steps = -(-B // TB_MAX)                      # ceil
    if B > 256 and n_steps < 2:
        n_steps = 2
    n_steps = max(n_steps, 1)
    TB = _round_up(-(-B // n_steps), 8)
    Bp = TB * n_steps                              # waste <= 8 rows per grid step
    return TB, Bp, n_steps


def mnist_net_forward(x, params):
    """x: [B, C, H, W] or [B, 784] float32. Returns logits [B, 10] float32."""
    B = x.shape[0]
    x2d = x.reshape(B, -1).astype(jnp.float32)                # torch.flatten(x, 1)
    assert x2d.shape[1] == IN_FEATURES, f"expected {IN_FEATURES} features, got {x2d.shape[1]}"

    (w1, b1), (w2, b2), (w3, b3), (w4, b4) = params

    TB, Bp, n_steps = _choose_batch_tiling(B)
    if Bp != B:                                               # tiny batch-dim pad only when needed
        x2d = jnp.pad(x2d, ((0, Bp - B), (0, 0)))

    # Zero-pad widths 10 -> 128 (exact zeros, never perturb real logits); bf16 MXU operands.
    w1p = _pad2d(w1, IN_FEATURES, H_PAD).astype(jnp.bfloat16)  # (784, 128)
    w2p = _pad2d(w2, H_PAD, H_PAD).astype(jnp.bfloat16)
    w3p = _pad2d(w3, H_PAD, H_PAD).astype(jnp.bfloat16)
    w4p = _pad2d(w4, H_PAD, H_PAD).astype(jnp.bfloat16)
    bias = jnp.concatenate(
        [_pad2d(b1, 1, H_PAD), _pad2d(b2, 1, H_PAD),
         _pad2d(b3, 1, H_PAD), _pad2d(b4, 1, H_PAD)], axis=0).astype(jnp.float32)  # (4, 128)

    # Constant index_map -> weights/biases stay VMEM-resident across grid steps.
    const = lambda shape: pl.BlockSpec(shape, lambda i: (0, 0))

    logits_padded = pl.pallas_call(
        mnist_mlp_kernel,
        out_shape=jax.ShapeDtypeStruct((Bp, H_PAD), jnp.bfloat16),
        grid=(n_steps,),
        in_specs=[
            pl.BlockSpec((TB, IN_FEATURES), lambda i: (i, 0)),  # x tile (pipelined, f32)
            const((IN_FEATURES, H_PAD)),                        # w1
            const((H_PAD, H_PAD)),                              # w2
            const((H_PAD, H_PAD)),                              # w3
            const((H_PAD, H_PAD)),                              # w4
            const((4, H_PAD)),                                  # packed biases
        ],
        out_specs=pl.BlockSpec((TB, H_PAD), lambda i: (i, 0)),
        compiler_params=pltpu.CompilerParams(
            dimension_semantics=("parallel",),                  # v7x: shard batch across 2 TCs
        ),
    )(x2d, w1p, w2p, w3p, w4p, bias)

    return logits_padded[:B, :OUT_FEATURES].astype(jnp.float32)


def init_params(key):
    """Deterministic init mimicking nn.Linear default: U(-1/sqrt(fan_in), +1/sqrt(fan_in)).
    Weights stored as [in, out] (transpose of PyTorch's [out, in]); biases as [1, out]."""
    dims = [(784, 10), (10, 10), (10, 10), (10, 10)]
    params = []
    for (fan_in, fan_out) in dims:
        key, kw, kb = jax.random.split(key, 3)
        bound = 1.0 / jnp.sqrt(jnp.float32(fan_in))
        w = jax.random.uniform(kw, (fan_in, fan_out), jnp.float32, -bound, bound)
        b = jax.random.uniform(kb, (1, fan_out), jnp.float32, -bound, bound)
        params.append((w, b))
    return params


def reference_forward(x, params):
    """Pure-JAX f32 reference (matches the PyTorch module's forward)."""
    h = x.reshape(x.shape[0], -1).astype(jnp.float32)
    (w1, b1), (w2, b2), (w3, b3), (w4, b4) = params
    h = jnp.maximum(h @ w1 + b1, 0.0)
    h = jnp.maximum(h @ w2 + b2, 0.0)
    h = jnp.maximum(h @ w3 + b3, 0.0)
    return h @ w4 + b4


if __name__ == "__main__":
    key = jax.random.PRNGKey(0)
    kp, kx = jax.random.split(key)

    params = init_params(kp)
    # MNIST-shaped input: NCHW [2, 1, 28, 28] -> flattens to [2, 784]
    x = jax.random.normal(kx, (2, 1, 28, 28), jnp.float32)

    out = mnist_net_forward(x, params)
    out = jax.block_until_ready(out)

    ref = reference_forward(x, params)
    assert out.shape == (2, 10)
    # bf16 MXU operands / bf16 logits store with f32 accumulation: modest tolerance vs f32 reference.
    # TODO(synk): numerics are bf16-input (not bit-faithful to the f32 PyTorch forward) by design.
    assert jnp.allclose(out, ref, atol=3e-2, rtol=3e-2), "mismatch vs JAX reference"

    print("KERNEL_OK")
</pallas_src>

<mosaic_0001>
module attributes {stable_mosaic.version = 11 : i64} {
  func.func @mnist_mlp_kernel(%arg0: i32, %arg1: memref<8x784xf32, #tpu.memory_space<vmem>>, %arg2: memref<784x128xbf16, #tpu.memory_space<vmem>>, %arg3: memref<128x128xbf16, #tpu.memory_space<vmem>>, %arg4: memref<128x128xbf16, #tpu.memory_space<vmem>>, %arg5: memref<128x128xbf16, #tpu.memory_space<vmem>>, %arg6: memref<4x128xf32, #tpu.memory_space<vmem>>, %arg7: memref<8x128xbf16, #tpu.memory_space<vmem>>) attributes {dimension_semantics = [#tpu.dimension_semantics<parallel>], iteration_bounds = array<i64: 1>, scalar_prefetch = 0 : i64, scratch_operands = 0 : i64, tpu.core_type = #tpu.core_type<tc>, window_params = [{transform_indices = @transform_0, window_bounds = array<i64: 8, 784>}, {pipeline_mode = #tpu.pipeline_mode<synchronous>, transform_indices = @transform_1, window_bounds = array<i64: 784, 128>}, {pipeline_mode = #tpu.pipeline_mode<synchronous>, transform_indices = @transform_2, window_bounds = array<i64: 128, 128>}, {pipeline_mode = #tpu.pipeline_mode<synchronous>, transform_indices = @transform_3, window_bounds = array<i64: 128, 128>}, {pipeline_mode = #tpu.pipeline_mode<synchronous>, transform_indices = @transform_4, window_bounds = array<i64: 128, 128>}, {pipeline_mode = #tpu.pipeline_mode<synchronous>, transform_indices = @transform_5, window_bounds = array<i64: 4, 128>}, {transform_indices = @transform_6, window_bounds = array<i64: 8, 128>}]} {
    %c0 = arith.constant 0 : index
    %c0_0 = arith.constant 0 : index
    %0 = vector.load %arg1[%c0, %c0_0] : memref<8x784xf32, #tpu.memory_space<vmem>>, vector<8x784xf32>
    %1 = arith.truncf %0 : vector<8x784xf32> to vector<8x784xbf16>
    %c0_1 = arith.constant 0 : index
    %c0_2 = arith.constant 0 : index
    %2 = vector.load %arg2[%c0_1, %c0_2] : memref<784x128xbf16, #tpu.memory_space<vmem>>, vector<784x128xbf16>
    %cst = arith.constant dense<0.000000e+00> : vector<8x128xf32>
    %3 = tpu.matmul %1, %2, %cst {dimension_numbers = #tpu.dot_dimension_numbers<[1], [0], [0], [1], [0, 0, 1, 1], [], []>} : vector<8x784xbf16>, vector<784x128xbf16>, vector<8x128xf32> -> vector<8x128xf32>
    %c0_3 = arith.constant 0 : index
    %c0_4 = arith.constant 0 : index
    %4 = vector.load %arg6[%c0_3, %c0_4] : memref<4x128xf32, #tpu.memory_space<vmem>>, vector<1x128xf32>
    %5 = vector.broadcast %4 : vector<1x128xf32> to vector<8x128xf32>
    %6 = arith.addf %3, %5 : vector<8x128xf32>
    %cst_5 = arith.constant 0.000000e+00 : f32
    %7 = vector.broadcast %cst_5 : f32 to vector<8x128xf32>
    %8 = arith.maximumf %6, %7 : vector<8x128xf32>
    %9 = arith.truncf %8 : vector<8x128xf32> to vector<8x128xbf16>
    %c0_6 = arith.constant 0 : index
    %c0_7 = arith.constant 0 : index
    %10 = vector.load %arg3[%c0_6, %c0_7] : memref<128x128xbf16, #tpu.memory_space<vmem>>, vector<128x128xbf16>
    %cst_8 = arith.constant dense<0.000000e+00> : vector<8x128xf32>
    %11 = tpu.matmul %9, %10, %cst_8 {dimension_numbers = #tpu.dot_dimension_numbers<[1], [0], [0], [1], [0, 0, 1, 1], [], []>} : vector<8x128xbf16>, vector<128x128xbf16>, vector<8x128xf32> -> vector<8x128xf32>
    %c1 = arith.constant 1 : index
    %c0_9 = arith.constant 0 : index
    %12 = vector.load %arg6[%c1, %c0_9] : memref<4x128xf32, #tpu.memory_space<vmem>>, vector<1x128xf32>
    %13 = vector.broadcast %12 : vector<1x128xf32> to vector<8x128xf32>
    %14 = arith.addf %11, %13 : vector<8x128xf32>
    %cst_10 = arith.constant 0.000000e+00 : f32
    %15 = vector.broadcast %cst_10 : f32 to vector<8x128xf32>
    %16 = arith.maximumf %14, %15 : vector<8x128xf32>
    %17 = arith.truncf %16 : vector<8x128xf32> to vector<8x128xbf16>
    %c0_11 = arith.constant 0 : index
    %c0_12 = arith.constant 0 : index
    %18 = vector.load %arg4[%c0_11, %c0_12] : memref<128x128xbf16, #tpu.memory_space<vmem>>, vector<128x128xbf16>
    %cst_13 = arith.constant dense<0.000000e+00> : vector<8x128xf32>
    %19 = tpu.matmul %17, %18, %cst_13 {dimension_numbers = #tpu.dot_dimension_numbers<[1], [0], [0], [1], [0, 0, 1, 1], [], []>} : vector<8x128xbf16>, vector<128x128xbf16>, vector<8x128xf32> -> vector<8x128xf32>
    %c2 = arith.constant 2 : index
    %c0_14 = arith.constant 0 : index
    %20 = vector.load %arg6[%c2, %c0_14] : memref<4x128xf32, #tpu.memory_space<vmem>>, vector<1x128xf32>
    %21 = vector.broadcast %20 : vector<1x128xf32> to vector<8x128xf32>
    %22 = arith.addf %19, %21 : vector<8x128xf32>
    %cst_15 = arith.constant 0.000000e+00 : f32
    %23 = vector.broadcast %cst_15 : f32 to vector<8x128xf32>
    %24 = arith.maximumf %22, %23 : vector<8x128xf32>
    %25 = arith.truncf %24 : vector<8x128xf32> to vector<8x128xbf16>
    %c0_16 = arith.constant 0 : index
    %c0_17 = arith.constant 0 : index
    %26 = vector.load %arg5[%c0_16, %c0_17] : memref<128x128xbf16, #tpu.memory_space<vmem>>, vector<128x128xbf16>
    %cst_18 = arith.constant dense<0.000000e+00> : vector<8x128xf32>
    %27 = tpu.matmul %25, %26, %cst_18 {dimension_numbers = #tpu.dot_dimension_numbers<[1], [0], [0], [1], [0, 0, 1, 1], [], []>} : vector<8x128xbf16>, vector<128x128xbf16>, vector<8x128xf32> -> vector<8x128xf32>
    %c3 = arith.constant 3 : index
    %c0_19 = arith.constant 0 : index
    %28 = vector.load %arg6[%c3, %c0_19] : memref<4x128xf32, #tpu.memory_space<vmem>>, vector<1x128xf32>
    %29 = vector.broadcast %28 : vector<1x128xf32> to vector<8x128xf32>
    %30 = arith.addf %27, %29 : vector<8x128xf32>
    %31 = arith.truncf %30 : vector<8x128xf32> to vector<8x128xbf16>
    %c0_20 = arith.constant 0 : index
    %c0_21 = arith.constant 0 : index
    %32 = vector.load %arg7[%c0_20, %c0_21] : memref<8x128xbf16, #tpu.memory_space<vmem>>, vector<8x128xbf16>
    tpu.vector_store %arg7[%c0_20, %c0_21], %31 {strides = array<i32>} : memref<8x128xbf16, #tpu.memory_space<vmem>>, vector<8x128xbf16>,
    return
  }
  func.func @transform_0(%arg0: i32) -> (i32, i32) {
    %c0_i32 = arith.constant 0 : i32
    %c0_i32_0 = arith.constant 0 : i32
    return %arg0, %c0_i32 : i32, i32
  }
  func.func @transform_1(%arg0: i32) -> (i32, i32) {
    %c0_i32 = arith.constant 0 : i32
    %c0_i32_0 = arith.constant 0 : i32
    %c0_i32_1 = arith.constant 0 : i32
    return %c0_i32, %c0_i32_0 : i32, i32
  }
  func.func @transform_2(%arg0: i32) -> (i32, i32) {
    %c0_i32 = arith.constant 0 : i32
    %c0_i32_0 = arith.constant 0 : i32
    %c0_i32_1 = arith.constant 0 : i32
    return %c0_i32, %c0_i32_0 : i32, i32
  }
  func.func @transform_3(%arg0: i32) -> (i32, i32) {
    %c0_i32 = arith.constant 0 : i32
    %c0_i32_0 = arith.constant 0 : i32
    %c0_i32_1 = arith.constant 0 : i32
    return %c0_i32, %c0_i32_0 : i32, i32
  }
  func.func @transform_4(%arg0: i32) -> (i32, i32) {
    %c0_i32 = arith.constant 0 : i32
    %c0_i32_0 = arith.constant 0 : i32
    %c0_i32_1 = arith.constant 0 : i32
    return %c0_i32, %c0_i32_0 : i32, i32
  }
  func.func @transform_5(%arg0: i32) -> (i32, i32) {
    %c0_i32 = arith.constant 0 : i32
    %c0_i32_0 = arith.constant 0 : i32
    %c0_i32_1 = arith.constant 0 : i32
    return %c0_i32, %c0_i32_0 : i32, i32
  }
  func.func @transform_6(%arg0: i32) -> (i32, i32) {
    %c0_i32 = arith.constant 0 : i32
    %c0_i32_0 = arith.constant 0 : i32
    return %arg0, %c0_i32 : i32, i32
  }
}

</mosaic_0001>

<bundles_post_ra>
// kernel: tpu_custom_call.1
= control target key start
LH: loop header
LB: loop body
LE: loop exit
PB: predicated region body
PF: predicated region fallthrough
CT: control target
= control target key end

     0   :  { %11 = vsyncpa [#allocation3], 0  ;;  %s1654_s0 = inlined_call_operand.hbm [shape: f32[8,784], index: 0, kind: input, shape index: {}]   ;;  %s1655_s1 = inlined_call_operand.hbm [shape: bf16[784,128], index: 1, kind: input, shape index: {}]   ;;  %s1656_s2 = inlined_call_operand.hbm [shape: bf16[128,128], index: 2, kind: input, shape index: {}]   ;;  %s1657_s3 = inlined_call_operand.hbm [shape: bf16[128,128], index: 3, kind: input, shape index: {}]   ;;  %s1658_s4 = inlined_call_operand.hbm [shape: bf16[128,128], index: 4, kind: input, shape index: {}]   ;;  %s1659_s5 = inlined_call_operand.vmem [shape: f32[4,128], index: 5, kind: input, shape index: {}]   ;;  %s1660_s6 = inlined_call_operand.hbm [shape: bf16[8,128], index: 6, kind: output, shape index: {}]  }
   0x1   :  { %12 = vsyncpa [#allocation6], 0 }
   0x2   :  { %13 = vsyncpa [#allocation9], 0 }
   0x3   :  { %14 = vsyncpa [#allocation4], 0  ;;  %s1480_s21 = smov [#allocation5]   ;;  %s1340_s25 = scalar_lea.hbm %s1655_s1, 6272 }
   0x4   :  { %s30_s22 = sshll.u32 %s1480_s21, 4  ;;  %p1341_p0 = scmp.ne.s32.totalorder %s1655_s1, %s1340_s25  ;;  %s31_s22 = int_to_ptr.vmem [resolvable:$true] %s30_s22 }
   0x5   :  { %p1344_p1 = scmp.lt.u32.totalorder %s1340_s25, %s1655_s1 }
   0x7   :  { %p1346_p2 = pnand %p1344_p1, %p1341_p0 }
   0x9   :  { %1349 = shalt.err (!%p1346_p2)
}
   0xa   :  { %s1350_s30 = scalar_lea.vmem %s31_s22, 6272  ;;  %p1355_p4 = scmp.lt.s32.totalorder %s31_s22, %s31_s22 }
   0xb   :  { %p1351_p3 = scmp.ne.s32.totalorder %s31_s22, %s1350_s30  ;;  %p1356_p5 = scmp.lt.s32.totalorder %s1350_s30, %s1350_s30 }
   0xd   :  { %p1357_p6 = por %p1356_p5, %p1355_p4 }
   0xf   :  { %p1358_p7 = pnand %p1357_p6, %p1351_p3 }
  0x11   :  { %1361 = shalt.err (!%p1358_p7)
}
  0x12   :  { %s1481_s7 = smov 64   ;;  %s1482_s8 = smov 4  }
  0x13   :  { %36 = dma.hbm_to_vmem [thread:$0]  %s1655_s1, 6272, %s31_s22, [#allocation6], %s1481_s7, %s1481_s7, %s1482_s8  }
  0x14   :  { %s1483_s11 = smov [#allocation8]   ;;  %s1484_s13 = smov [#allocation2]  }
  0x15   :  { %s54_s12 = sshll.u32 %s1483_s11, 4  ;;  %s21_s14 = sshll.u32 %s1484_s13, 4  ;;  %s55_s12 = int_to_ptr.vmem [resolvable:$true] %s54_s12  ;;  %s22_s14 = int_to_ptr.vmem [resolvable:$true] %s21_s14 }
  0x16   :  { %s1362_s17 = scalar_lea.hbm %s1657_s3, 1024 }
  0x17   :  { %p1363_p8 = scmp.ne.s32.totalorder %s1657_s3, %s1362_s17  ;;  %p1366_p9 = scmp.lt.u32.totalorder %s1362_s17, %s1657_s3 }
  0x19   :  { %p1368_p10 = pnand %p1366_p9, %p1363_p8 }
  0x1b   :  { %1371 = shalt.err (!%p1368_p10)
}
  0x1c   :  { %s1372_s1 = scalar_lea.vmem %s55_s12, 1024  ;;  %p1377_p12 = scmp.lt.s32.totalorder %s55_s12, %s55_s12 }
  0x1d   :  { %p1373_p11 = scmp.ne.s32.totalorder %s55_s12, %s1372_s1  ;;  %p1378_p13 = scmp.lt.s32.totalorder %s1372_s1, %s1372_s1 }
  0x1f   :  { %p1379_p0 = por %p1378_p13, %p1377_p12 }
  0x21   :  { %p1380_p1 = pnand %p1379_p0, %p1373_p11 }
  0x23   :  { %1383 = shalt.err (!%p1380_p1)
}
  0x24   :  { %60 = dma.hbm_to_vmem [thread:$0]  %s1657_s3, 1024, %s55_s12, [#allocation9], %s1481_s7, %s1481_s7, %s1482_s8  }
  0x25   :  { %s1384_s26 = scalar_lea.hbm %s1654_s0, 896 }
  0x26   :  { %p1385_p2 = scmp.ne.s32.totalorder %s1654_s0, %s1384_s26  ;;  %p1388_p3 = scmp.lt.u32.totalorder %s1384_s26, %s1654_s0 }
  0x28   :  { %p1390_p4 = pnand %p1388_p3, %p1385_p2 }
  0x2a   :  { %1393 = shalt.err (!%p1390_p4)
}
  0x2b   :  { %s1394_s9 = scalar_lea.vmem %s22_s14, 896  ;;  %p1399_p6 = scmp.lt.s32.totalorder %s22_s14, %s22_s14 }
  0x2c   :  { %p1395_p5 = scmp.ne.s32.totalorder %s22_s14, %s1394_s9  ;;  %p1400_p7 = scmp.lt.s32.totalorder %s1394_s9, %s1394_s9 }
  0x2e   :  { %p1401_p8 = por %p1400_p7, %p1399_p6 }
  0x30   :  { %p1402_p9 = pnand %p1401_p8, %p1395_p5 }
  0x32   :  { %1405 = shalt.err (!%p1402_p9)
}
  0x33   :  { %24 = dma.hbm_to_vmem [thread:$0]  %s1654_s0, 896, %s22_s14, [#allocation3]  }
  0x34   :  { %s1485_s11 = smov [#allocation7]   ;;  %s1486_s13 = smov [#allocation10]  }
  0x35   :  { %s42_s12 = sshll.u32 %s1485_s11, 4  ;;  %s66_s15 = sshll.u32 %s1486_s13, 4  ;;  %s43_s12 = int_to_ptr.vmem [resolvable:$true] %s42_s12  ;;  %s67_s15 = int_to_ptr.vmem [resolvable:$true] %s66_s15 }
  0x36   :  { %s1406_s18 = scalar_lea.hbm %s1656_s2, 1024 }
  0x37   :  { %p1407_p10 = scmp.ne.s32.totalorder %s1656_s2, %s1406_s18  ;;  %p1410_p11 = scmp.lt.u32.totalorder %s1406_s18, %s1656_s2 }
  0x39   :  { %p1412_p12 = pnand %p1410_p11, %p1407_p10 }
  0x3b   :  { %1415 = shalt.err (!%p1412_p12)
}
  0x3c   :  { %s1416_s0 = scalar_lea.vmem %s43_s12, 1024  ;;  %p1421_p0 = scmp.lt.s32.totalorder %s43_s12, %s43_s12 }
  0x3d   :  { %p1417_p13 = scmp.ne.s32.totalorder %s43_s12, %s1416_s0  ;;  %p1422_p1 = scmp.lt.s32.totalorder %s1416_s0, %s1416_s0 }
  0x3f   :  { %p1423_p2 = por %p1422_p1, %p1421_p0 }
  0x41   :  { %p1424_p3 = pnand %p1423_p2, %p1417_p13 }
  0x43   :  { %1427 = shalt.err (!%p1424_p3)
}
  0x44   :  { %48 = dma.hbm_to_vmem [thread:$0]  %s1656_s2, 1024, %s43_s12, [#allocation6], %s1481_s7, %s1481_s7, %s1482_s8  }
  0x45   :  { %s1428_s25 = scalar_lea.hbm %s1658_s4, 1024 }
  0x46   :  { %p1429_p4 = scmp.ne.s32.totalorder %s1658_s4, %s1428_s25  ;;  %p1432_p5 = scmp.lt.u32.totalorder %s1428_s25, %s1658_s4 }
  0x48   :  { %p1434_p6 = pnand %p1432_p5, %p1429_p4 }
  0x4a   :  { %1437 = shalt.err (!%p1434_p6)
}
  0x4b   :  { %s1438_s30 = scalar_lea.vmem %s67_s15, 1024  ;;  %p1443_p8 = scmp.lt.s32.totalorder %s67_s15, %s67_s15 }
  0x4c   :  { %p1439_p7 = scmp.ne.s32.totalorder %s67_s15, %s1438_s30  ;;  %p1444_p9 = scmp.lt.s32.totalorder %s1438_s30, %s1438_s30 }
  0x4e   :  { %p1445_p10 = por %p1444_p9, %p1443_p8 }
  0x50   :  { %p1446_p11 = pnand %p1445_p10, %p1439_p7 }
  0x52   :  { %1449 = shalt.err (!%p1446_p11)
}
  0x53   :  { %72 = dma.hbm_to_vmem [thread:$0]  %s1658_s4, 1024, %s67_s15, [#allocation9], %s1481_s7, %s1481_s7, %s1482_s8  }
  0x54   :  { %1472 = dma.done.wait [#allocation3], 896  }
  0x55   :  { %1473 = vsyncadd [#allocation3], 4294966400 }
  0x56   :  { %1474 = dma.done.wait [#allocation6], 7296  }
  0x57   :  { %1475 = vsyncadd [#allocation6], 4294960000 }
  0x58   :  { %1476 = dma.done.wait [#allocation9], 2048  }
  0x59   :  { %1477 = vsyncadd [#allocation9], 4294965248  ;;  %v1267_v0 = vld [vmem:[#allocation5 + $0x40] sm:$0xff]   ;;  %v1271_v4 = vld [vmem:[#allocation5 + $0x48] sm:$0xff]   ;;  %v1487_v44 = vmov 0.0   ;;  %vm1488_vm0 = vmmov 0  }
  0x5a   :  { %v1268_v1 = vld [vmem:[#allocation5] sm:$0xff]   ;;  %1096 = vmatprep.subr.bf16.mxu0 %v1267_v0  ;;  %v1272_v5 = vld [vmem:[#allocation5 + $0x8] sm:$0xff]   ;;  %v1275_v8 = vld [vmem:[#allocation5 + $0x50] sm:$0xff]   ;;  %vm502_vm1 = vcmask 130048   ;;  %s1489_s15 = smov [#allocation11]  }
  0x5b   :  { %v1269_v2 = vld [vmem:[#allocation5 + $0xc0] sm:$0xff]   ;;  %1097 = vmatpush3.bf16.msra.mxu0 %v1268_v1  ;;  %v1273_v6 = vld [vmem:[#allocation5 + $0xc8] sm:$0xff]   ;;  %v1276_v9 = vld [vmem:[#allocation5 + $0x10] sm:$0xff]   ;;  %s1007_s16 = sshll.u32 %s1489_s15, 4  ;;  %s1008_s16 = int_to_ptr.vmem [resolvable:$true] %s1007_s16 }
  0x5c   :  { %v1270_v3 = vld [vmem:[#allocation5 + $0x80] sm:$0xff]   ;;  %1118 = vmatprep.subr.bf16.mxu1 %v1269_v2  ;;  %1098 = vmatprep.subr.bf16.mxu0 %v1271_v4  ;;  %v1274_v7 = vld [vmem:[#allocation5 + $0x88] sm:$0xff]   ;;  %v1277_v10 = vld [vmem:[#allocation5 + $0xd0] sm:$0xff]   ;;  %s1450_s17 = scalar_lea.vmem %s1008_s16, 64  ;;  %p1455_p13 = scmp.lt.s32.totalorder %s1008_s16, %s1008_s16 }
  0x5d   :  { %1119 = vmatpush3.bf16.msra.mxu1 %v1270_v3  ;;  %v1278_v11 = vld [vmem:[#allocation5 + $0x90] sm:$0xff]   ;;  %v1279_v12 = vld [vmem:[#allocation5 + $0x58] sm:$0xff]   ;;  %v1283_v16 = vld [vmem:[#allocation5 + $0x60] sm:$0xff]   ;;  %p1451_p12 = scmp.ne.s32.totalorder %s1008_s16, %s1450_s17  ;;  %p1456_p0 = scmp.lt.s32.totalorder %s1450_s17, %s1450_s17 }
  0x5e   :  { %1120 = vmatprep.subr.bf16.mxu1 %v1273_v6  ;;  %v1280_v13 = vld [vmem:[#allocation5 + $0x18] sm:$0xff]   ;;  %v1284_v17 = vld [vmem:[#allocation5 + $0x20] sm:$0xff]   ;;  %v1287_v20 = vld [vmem:[#allocation5 + $0x68] sm:$0xff]  }
  0x5f   :  { %1099 = vmatpush3.bf16.msra.mxu0 %v1272_v5  ;;  %v1281_v14 = vld [vmem:[#allocation5 + $0xd8] sm:$0xff]   ;;  %v1285_v18 = vld [vmem:[#allocation5 + $0xe0] sm:$0xff]   ;;  %v1288_v21 = vld [vmem:[#allocation5 + $0x28] sm:$0xff]   ;;  %p1457_p1 = por %p1456_p0, %p1455_p13 }
  0x60   :  { %1100 = vmatprep.subr.bf16.mxu0 %v1275_v8  ;;  %v1282_v15 = vld [vmem:[#allocation5 + $0x98] sm:$0xff]   ;;  %v1286_v19 = vld [vmem:[#allocation5 + $0xa0] sm:$0xff]   ;;  %v1289_v22 = vld [vmem:[#allocation5 + $0xe8] sm:$0xff]  }
  0x61   :  { %1121 = vmatpush3.bf16.msra.mxu1 %v1274_v7  ;;  %v1290_v23 = vld [vmem:[#allocation5 + $0xa8] sm:$0xff]   ;;  %v1291_v24 = vld [vmem:[#allocation5 + $0x70] sm:$0xff]   ;;  %v1295_v28 = vld [vmem:[#allocation5 + $0x78] sm:$0xff]   ;;  %p1458_p2 = pnand %p1457_p1, %p1451_p12 }
  0x62   :  { %1122 = vmatprep.subr.bf16.mxu1 %v1277_v10  ;;  %v1292_v25 = vld [vmem:[#allocation5 + $0x30] sm:$0xff]   ;;  %v1296_v29 = vld [vmem:[#allocation5 + $0x38] sm:$0xff]   ;;  %v91_v34 = vld [vmem:[#allocation2] sm:$0xff] }
  0x63   :  { %1101 = vmatpush3.bf16.msra.mxu0 %v1276_v9  ;;  %v1293_v26 = vld [vmem:[#allocation5 + $0xf0] sm:$0xff]   ;;  %v1297_v30 = vld [vmem:[#allocation5 + $0xf8] sm:$0xff]   ;;  %v98_v35 = vpack.c.bf16 %v91_v34, %v91_v34  ;;  %v1299_v36 = vld [vmem:[#allocation5 + $0x140] sm:$0xff]  }
  0x64   :  { %1102 = vmatprep.subr.bf16.mxu0 %v1279_v12  ;;  %v1294_v27 = vld [vmem:[#allocation5 + $0xb0] sm:$0xff]   ;;  %v1298_v33 = vld [vmem:[#allocation5 + $0xb8] sm:$0xff]   ;;  %v94_v37 = vld [vmem:[#allocation2 + $0x18] sm:$0xff] }
  0x65   :  { %1123 = vmatpush3.bf16.msra.mxu1 %v1278_v11  ;;  %v92_v31 = vld [vmem:[#allocation2 + $0x8] sm:$0xff]  ;;  %v101_v38 = vpack.c.bf16 %v94_v37, %v94_v37  ;;  %v1300_v39 = vld [vmem:[#allocation5 + $0x100] sm:$0xff]   ;;  %v93_v40 = vld [vmem:[#allocation2 + $0x10] sm:$0xff] }
  0x66   :  { %1124 = vmatprep.subr.bf16.mxu1 %v1281_v14  ;;  %v99_v32 = vpack.c.bf16 %v92_v31, %v92_v31  ;;  %v100_v41 = vpack.c.bf16 %v93_v40, %v93_v40  ;;  %v1301_v42 = vld [vmem:[#allocation5 + $0x148] sm:$0xff]   ;;  %v1303_v45 = vld [vmem:[#allocation5 + $0x150] sm:$0xff]   ;;  %v1305_v47 = vld [vmem:[#allocation5 + $0x158] sm:$0xff]  }
  0x67   :  { %1103 = vmatpush3.bf16.msra.mxu0 %v1280_v13  ;;  %578 = vmatprep.mubr.bf16.mxu1 %v101_v38  ;;  %v1302_v43 = vld [vmem:[#allocation5 + $0x108] sm:$0xff]   ;;  %v1304_v46 = vld [vmem:[#allocation5 + $0x110] sm:$0xff]   ;;  %v1306_v48 = vld [vmem:[#allocation5 + $0x118] sm:$0xff]  }
  0x68   :  { %1104 = vmatprep.subr.bf16.mxu0 %v1283_v16  ;;  %538 = vmatprep.mubr.bf16.mxu0 %v99_v32  ;;  %v1307_v49 = vld [vmem:[#allocation5 + $0x160] sm:$0xff]   ;;  %v1309_v51 = vld [vmem:[#allocation5 + $0x168] sm:$0xff]   ;;  %v96_v54 = vld [vmem:[#allocation2 + $0x28] sm:$0xff] }
  0x69   :  { %1125 = vmatpush3.bf16.msra.mxu1 %v1282_v15  ;;  %v1308_v50 = vld [vmem:[#allocation5 + $0x120] sm:$0xff]   ;;  %v1310_v52 = vld [vmem:[#allocation5 + $0x128] sm:$0xff]   ;;  %v1311_v55 = vld [vmem:[#allocation5 + $0x170] sm:$0xff]   ;;  %v103_v56 = vpack.c.bf16 %v96_v54, %v96_v54 }
  0x6a   :  { %1126 = vmatprep.subr.bf16.mxu1 %v1285_v18  ;;  %v1315_v53 = vld [vmem:[#allocation5 + $0x180] sm:$0xff]   ;;  %v97_v57 = vld [vmem:[#allocation2 + $0x30] sm:$0xff]  ;;  %v1312_v59 = vld [vmem:[#allocation5 + $0x130] sm:$0xff]  }
  0x6b   :  { %1105 = vmatpush3.bf16.msra.mxu0 %v1284_v17  ;;  %v104_v58 = vpack.c.bf16 %v97_v57, %v97_v57  ;;  %v1313_v60 = vld [vmem:[#allocation5 + $0x178] sm:$0xff]   ;;  %v95_v62 = vld [vmem:[#allocation2 + $0x20] sm:$0xff]  ;;  %v1317_v1 = vld [vmem:[#allocation7 + $0x8] sm:$0xff]  }
  0x6c   :  { %1106 = vmatprep.subr.bf16.mxu0 %v1287_v20  ;;  %v1314_v61 = vld [vmem:[#allocation5 + $0x138] sm:$0xff]   ;;  %v102_v63 = vpack.c.bf16 %v95_v62, %v95_v62  ;;  %v1316_v0 = vld [vmem:[#allocation7] sm:$0xff]   ;;  %v1319_v3 = vld [vmem:[#allocation7 + $0x18] sm:$0xff]  }
  0x6d   :  { %1127 = vmatpush3.bf16.msra.mxu1 %v1286_v19  ;;  %v1318_v2 = vld [vmem:[#allocation7 + $0x10] sm:$0xff]   ;;  %v1320_v4 = vld [vmem:[#allocation7 + $0x20] sm:$0xff]   ;;  %v1321_v5 = vld [vmem:[#allocation7 + $0x28] sm:$0xff]  }
  0x6e   :  { %1128 = vmatprep.subr.bf16.mxu1 %v1289_v22  ;;  %v1322_v6 = vld [vmem:[#allocation7 + $0x30] sm:$0xff]   ;;  %v1323_v7 = vld [vmem:[#allocation7 + $0x38] sm:$0xff]   ;;  %v1324_v8 = vld [vmem:[#allocation8] sm:$0xff]  }
  0x6f   :  { %1107 = vmatpush3.bf16.msra.mxu0 %v1288_v21  ;;  %v1325_v9 = vld [vmem:[#allocation8 + $0x8] sm:$0xff]   ;;  %v1326_v10 = vld [vmem:[#allocation8 + $0x10] sm:$0xff]   ;;  %v1327_v11 = vld [vmem:[#allocation8 + $0x18] sm:$0xff]  }
  0x70   :  { %1108 = vmatprep.subr.bf16.mxu0 %v1291_v24  ;;  %v1328_v12 = vld [vmem:[#allocation8 + $0x20] sm:$0xff]   ;;  %v1329_v13 = vld [vmem:[#allocation8 + $0x28] sm:$0xff]   ;;  %v1330_v40 = vld [vmem:[#allocation8 + $0x30] sm:$0xff]  }
  0x71   :  { %1129 = vmatpush3.bf16.msra.mxu1 %v1290_v23  ;;  %v1018_v15 = vld [vmem:[%s1659_s5] ss:$0 sm:$0xff]  ;;  %v1338_v57 = vld [vmem:[#allocation10 + $0x30] sm:$0xff]  }
  0x72   :  { %1130 = vmatprep.subr.bf16.mxu1 %v1293_v26 }
  0x73   :  { %1109 = vmatpush3.bf16.msra.mxu0 %v1292_v25 }
  0x74   :  { %1110 = vmatprep.subr.bf16.mxu0 %v1295_v28 }
  0x75   :  { %1131 = vmatpush3.bf16.msra.mxu1 %v1294_v27 }
  0x76   :  { %1132 = vmatprep.subr.bf16.mxu1 %v1297_v30 }
  0x77   :  { %1111 = vmatpush3.bf16.msra.mxu0 %v1296_v29 }
  0x78   :  { %1140 = vmatprep.subr.bf16.mxu0 %v1299_v36 }
  0x79   :  { %1133 = vmatpush3.bf16.msra.mxu1 %v1298_v33 }
  0x7a   :  { %539 = vmatmul.mubr.bf16.vlgmr.msra.gmra.mrb[0].mxu0 %v98_v35  ;;  %1191 = vmatprep.subr.bf16.mxu1 %v1487_v44 }
  0x7b   :  { %1141 = vmatpush3.bf16.msra.mxu0 %v1300_v39  ;;  %618 = vmatprep.mubr.bf16.mxu0 %v103_v56 }
  0x7c   :  { %579 = vmatmul.mubr.bf16.vlgmr.msra.gmra.mrb[0].mxu1 %v100_v41  ;;  %1142 = vmatprep.subr.bf16.mxu0 %v1301_v42  ;;  %v1331_v41 = vld [vmem:[#allocation8 + $0x38] sm:$0xff]   ;;  %v1332_v42 = vld [vmem:[#allocation10] sm:$0xff]  }
  0x7d   :  { %1193 = vmatprep.mubr.msk.bf16.mxu1 %vm1488_vm0, %v1487_v44  ;;  %1192 = vmatpush3.bf16.msra.mxu1 %v1315_v53 }
  0x7e   :  { %1197 = vmatprep.subr.bf16.mxu1 %v1487_v44 }
  0x7f   :  { %1143 = vmatpush3.bf16.msra.mxu0 %v1302_v43  ;;  %v1333_v43 = vld [vmem:[#allocation10 + $0x8] sm:$0xff]  }
  0x80   :  { %1144 = vmatprep.subr.bf16.mxu0 %v1303_v45  ;;  %v1334_v45 = vld [vmem:[#allocation10 + $0x10] sm:$0xff]  }
  0x83   :  { %1145 = vmatpush3.bf16.msra.mxu0 %v1304_v46  ;;  %v1335_v46 = vld [vmem:[#allocation10 + $0x18] sm:$0xff]  }
  0x84   :  { %1146 = vmatprep.subr.bf16.mxu0 %v1305_v47  ;;  %1194 = vmatmul.mubr.msk.bf16.vlgmr.msra.gmra.mrb[4].mxu1 %vm502_vm1, %v104_v58  ;;  %v1336_v47 = vld [vmem:[#allocation10 + $0x20] sm:$0xff]   ;;  %v1339_v58 = vld [vmem:[#allocation10 + $0x38] sm:$0xff]  }
  0x85   :  { %1213 = vmatprep.mubr.msk.bf16.mxu1 %vm1488_vm0, %v1487_v44  ;;  %1198 = vmatpush3.bf16.msra.mxu1 %v1316_v0 }
  0x86   :  { %1199 = vmatprep.subr.bf16.mxu1 %v1487_v44 }
  0x87   :  { %1147 = vmatpush3.bf16.msra.mxu0 %v1306_v48  ;;  %v1337_v48 = vld [vmem:[#allocation10 + $0x28] sm:$0xff]  }
  0x88   :  { %1148 = vmatprep.subr.bf16.mxu0 %v1307_v49  ;;  %v1069_v49 = vld [vmem:[%s1659_s5 + $0x1] ss:$0 sm:$0xff] }
  0x89   :  { %1200 = vmatpush3.bf16.msra.mxu1 %v1317_v1 }
  0x8a   :  { %1201 = vmatprep.subr.bf16.mxu1 %v1487_v44 }
  0x8b   :  { %1149 = vmatpush3.bf16.msra.mxu0 %v1308_v50 }
  0x8c   :  { %1150 = vmatprep.subr.bf16.mxu0 %v1309_v51 }
  0x8d   :  { %1202 = vmatpush3.bf16.msra.mxu1 %v1318_v2 }
  0x8e   :  { %1203 = vmatprep.subr.bf16.mxu1 %v1487_v44 }
  0x8f   :  { %1151 = vmatpush3.bf16.msra.mxu0 %v1310_v52 }
  0x90   :  { %1152 = vmatprep.subr.bf16.mxu0 %v1311_v55 }
  0x91   :  { %1204 = vmatpush3.bf16.msra.mxu1 %v1319_v3  ;;  %v1087_v3 = vld [vmem:[%s1659_s5 + $0x3] ss:$0 sm:$0xff] }
  0x92   :  { %1205 = vmatprep.subr.bf16.mxu1 %v1487_v44 }
  0x93   :  { %1153 = vmatpush3.bf16.msra.mxu0 %v1312_v59  ;;  %v1078_v59 = vld [vmem:[%s1659_s5 + $0x2] ss:$0 sm:$0xff] }
  0x94   :  { %1154 = vmatprep.subr.bf16.mxu0 %v1313_v60 }
  0x95   :  { %1206 = vmatpush3.bf16.msra.mxu1 %v1320_v4 }
  0x96   :  { %1207 = vmatprep.subr.bf16.mxu1 %v1487_v44 }
  0x97   :  { %1155 = vmatpush3.bf16.msra.mxu0 %v1314_v61 }
  0x98   :  { %1217 = vmatprep.subr.bf16.mxu0 %v1487_v44 }
  0x99   :  { %1208 = vmatpush3.bf16.msra.mxu1 %v1321_v5 }
  0x9a   :  { %619 = vmatmul.mubr.bf16.vlgmr.msra.gmra.mrb[4].mxu0 %v102_v63  ;;  %1209 = vmatprep.subr.bf16.mxu1 %v1487_v44 }
  0x9b   :  { %1233 = vmatprep.mubr.msk.bf16.mxu0 %vm1488_vm0, %v1487_v44  ;;  %1218 = vmatpush3.bf16.msra.mxu0 %v1324_v8 }
  0x9c   :  { %1219 = vmatprep.subr.bf16.mxu0 %v1487_v44 }
  0x9d   :  { %1210 = vmatpush3.bf16.msra.mxu1 %v1322_v6 }
  0x9e   :  { %1211 = vmatprep.subr.bf16.mxu1 %v1487_v44 }
  0x9f   :  { %1220 = vmatpush3.bf16.msra.mxu0 %v1325_v9 }
  0xa0   :  { %1221 = vmatprep.subr.bf16.mxu0 %v1487_v44 }
  0xa1   :  { %1212 = vmatpush3.bf16.msra.mxu1 %v1323_v7 }
  0xa2   :  { %1237 = vmatprep.subr.bf16.mxu1 %v1487_v44 }
  0xa3   :  { %1222 = vmatpush3.bf16.msra.mxu0 %v1326_v10 }
  0xa4   :  { %1223 = vmatprep.subr.bf16.mxu0 %v1487_v44 }
  0xa7   :  { %1224 = vmatpush3.bf16.msra.mxu0 %v1327_v11 }
  0xa8   :  { %1225 = vmatprep.subr.bf16.mxu0 %v1487_v44 }
  0xab   :  { %1226 = vmatpush3.bf16.msra.mxu0 %v1328_v12 }
  0xac   :  { %1227 = vmatprep.subr.bf16.mxu0 %v1487_v44 }
  0xaf   :  { %1228 = vmatpush3.bf16.msra.mxu0 %v1329_v13 }
  0xb0   :  { %1229 = vmatprep.subr.bf16.mxu0 %v1487_v44 }
  0xb3   :  { %1230 = vmatpush3.bf16.msra.mxu0 %v1330_v40 }
  0xb4   :  { %1231 = vmatprep.subr.bf16.mxu0 %v1487_v44 }
  0xb7   :  { %1232 = vmatpush3.bf16.msra.mxu0 %v1331_v41 }
 0x14d   :  { %v1112_v14 = vpop.f32.mrb[0].mxu0 }
 0x14e   :  { %v1113_v16 = vpop.f32.mrb[1].mxu0 }
 0x14f   :  { %v1114_v17 = vadd.f32 %v1113_v16, %v1112_v14  ;;  %v1115_v18 = vpop.f32.mrb[2].mxu0  ;;  %v1134_v19 = vpop.f32.mrb[0].mxu1 }
 0x150   :  { %v1116_v20 = vpop.f32.mrb[3].mxu0  ;;  %v1135_v22 = vpop.f32.mrb[1].mxu1 }
 0x151   :  { %v541_v21 = vadd.f32 %v1114_v17, %v1018_v15  ;;  %v1136_v23 = vadd.f32 %v1135_v22, %v1134_v19  ;;  %v1137_v24 = vpop.f32.mrb[2].mxu1 }
 0x152   :  { %v1138_v25 = vpop.f32.mrb[3].mxu1 }
 0x153   :  { %v581_v26 = vadd.f32 %v1136_v23, %v541_v21 }
 0x157   :  { %v660_v27 = vpop.f32.mrb[4].mxu1 }
 0x158   :  { %v1195_v28 = vpop.f32.mrb[5].mxu1 }
 0x159   :  { %v663_v29 = vpop.f32.mrb[6].mxu1 }
 0x15a   :  { %v1196_v30 = vpop.f32.mrb[7].mxu1 }
 0x16d   :  { %v1156_v31 = vpop.f32.mrb[4].mxu0 }
 0x16e   :  { %v1157_v32 = vpop.f32.mrb[5].mxu0 }
 0x16f   :  { %v1158_v33 = vadd.f32 %v1157_v32, %v1156_v31  ;;  %v1159_v34 = vpop.f32.mrb[6].mxu0 }
 0x170   :  { %v1160_v35 = vpop.f32.mrb[7].mxu0 }
 0x171   :  { %v621_v36 = vadd.f32 %v1158_v33, %v581_v26 }
 0x173   :  { %v661_v37 = vadd.f32 %v660_v27, %v621_v36 }
 0x175   :  { %v666_v38 = vmax.f32 %v661_v37, 0.0 }
 0x177   :  { %v667_v39 = vpack.c.bf16 %v666_v38, %v666_v38 }
 0x179   :  { %1214 = vmatmul.mubr.bf16.vlgmr.msra.gmra.mrb[8].mxu1 %v667_v39 }
 0x17a   :  { %1253 = vmatprep.mubr.msk.bf16.mxu1 %vm1488_vm0, %v1487_v44  ;;  %1238 = vmatpush3.bf16.msra.mxu1 %v1332_v42 }
 0x17b   :  { %1239 = vmatprep.subr.bf16.mxu1 %v1487_v44 }
 0x17e   :  { %1240 = vmatpush3.bf16.msra.mxu1 %v1333_v43 }
 0x17f   :  { %1241 = vmatprep.subr.bf16.mxu1 %v1487_v44 }
 0x182   :  { %1242 = vmatpush3.bf16.msra.mxu1 %v1334_v45 }
 0x183   :  { %1243 = vmatprep.subr.bf16.mxu1 %v1487_v44 }
 0x186   :  { %1244 = vmatpush3.bf16.msra.mxu1 %v1335_v46 }
 0x187   :  { %1245 = vmatprep.subr.bf16.mxu1 %v1487_v44 }
 0x18a   :  { %1246 = vmatpush3.bf16.msra.mxu1 %v1336_v47 }
 0x18b   :  { %1247 = vmatprep.subr.bf16.mxu1 %v1487_v44 }
 0x18e   :  { %1248 = vmatpush3.bf16.msra.mxu1 %v1337_v48 }
 0x18f   :  { %1249 = vmatprep.subr.bf16.mxu1 %v1487_v44 }
 0x192   :  { %1250 = vmatpush3.bf16.msra.mxu1 %v1338_v57 }
 0x193   :  { %1251 = vmatprep.subr.bf16.mxu1 %v1487_v44 }
 0x196   :  { %1252 = vmatpush3.bf16.msra.mxu1 %v1339_v58 }
 0x24c   :  { %v771_v50 = vpop.f32.mrb[8].mxu1 }
 0x24d   :  { %v772_v51 = vadd.f32 %v1069_v49, %v771_v50  ;;  %v1215_v52 = vpop.f32.mrb[9].mxu1 }
 0x24e   :  { %v774_v53 = vpop.f32.mrb[10].mxu1 }
 0x24f   :  { %v777_v54 = vmax.f32 %v772_v51, 0.0  ;;  %v1216_v55 = vpop.f32.mrb[11].mxu1 }
 0x251   :  { %v778_v56 = vpack.c.bf16 %v777_v54, %v777_v54 }
 0x253   :  { %1234 = vmatmul.mubr.bf16.vlgmr.msra.gmra.mrb[8].mxu0 %v778_v56 }
 0x326   :  { %v882_v60 = vpop.f32.mrb[8].mxu0 }
 0x327   :  { %v883_v61 = vadd.f32 %v1078_v59, %v882_v60  ;;  %v1235_v62 = vpop.f32.mrb[9].mxu0 }
 0x328   :  { %v885_v63 = vpop.f32.mrb[10].mxu0 }
 0x329   :  { %v888_v0 = vmax.f32 %v883_v61, 0.0  ;;  %v1236_v1 = vpop.f32.mrb[11].mxu0 }
 0x32b   :  { %v889_v2 = vpack.c.bf16 %v888_v0, %v888_v0 }
 0x32d   :  { %1254 = vmatmul.mubr.bf16.vlgmr.msra.gmra.mrb[12].mxu1 %v889_v2 }
 0x400   :  { %v993_v4 = vpop.f32.mrb[12].mxu1 }
 0x401   :  { %v994_v44 = vadd.f32 %v1087_v3, %v993_v4  ;;  %v1255_v5 = vpop.f32.mrb[13].mxu1 }
 0x402   :  { %v996_v6 = vpop.f32.mrb[14].mxu1 }
 0x403   :  { %v999_v7 = vpack.c.bf16 %v994_v44, %v994_v44  ;;  %v1256_v8 = vpop.f32.mrb[15].mxu1 }
 0x405   :  { %1000 = vst [vmem:[#allocation11] sm:$0xf] %v999_v7 }
 0x406   :  { %1461 = shalt.err (!%p1458_p2)
}
 0x407   :  { %s1462_s5 = scalar_lea.hbm %s1660_s6, 64 }
 0x408   :  { %p1463_p3 = scmp.ne.s32.totalorder %s1660_s6, %s1462_s5  ;;  %p1466_p4 = scmp.lt.u32.totalorder %s1462_s5, %s1660_s6 }
 0x40a   :  { %p1468_p5 = pnand %p1466_p4, %p1463_p3 }
 0x40c   :  { %1471 = shalt.err (!%p1468_p5)
}
 0x40d   :  { %1010 = dma.vmem_to_hbm [thread:$0]  %s1008_s16, 64, %s1660_s6, [#allocation4]  }
 0x40e   :  { %1478 = dma.done.wait [#allocation4], 64  }
 0x40f   :  { %1479 = vsyncadd [#allocation4], 4294967232 }
 0x410   :  { %1014 = vsyncpa [#allocation3], 1 }
 0x411   :  { %1015 = vsyncpa [#allocation6], 1 }
 0x412   :  { %1016 = vsyncpa [#allocation9], 1 }
 0x413   :  { %1017 = vsyncpa [#allocation4], 1 }

</bundles_post_ra>
